<compile_context>
chip_gen: v6e
topology: v6e:2x2x1
jax: 0.10.0
libtpu: 0.0.40
codegen_flags: <defaults>
</compile_context>

<pallas_src>
import jax
import jax.numpy as jnp
from jax import lax
from jax.experimental import pallas as pl
from jax.experimental.pallas import tpu as pltpu

_EPS = 1e-12             # F.normalize default eps
_EPS_SQ = _EPS * _EPS    # clamp on squared norms: rsqrt(max(x^2, eps^2)) == 1/max(|x|, eps)

# Conservative budget for the auto-pipelined input buffers:
#   2 inputs x 2 pipeline buffers x tm x C x itemsize  <=  8 MiB
# This fits the default scoped VMEM of every generation (16 MiB v5e,
# 32 MiB v6e/v7x) with headroom, so no vmem_limit_bytes override is needed.
_PIPELINE_INPUT_BUDGET_BYTES = 8 * 1024 * 1024
_MAX_ROW_TILE = 2048
_NUM_ROW_SPLITS = 2      # leading "parallel" axis -> both TCs on v7x


def _round_up(x, m):
    return ((x + m - 1) // m) * m


def _pick_row_tile(rows_per_split, channels, itemsize):
    tm = _PIPELINE_INPUT_BUDGET_BYTES // (2 * 2 * channels * itemsize)
    tm = max(8, (tm // 8) * 8)
    tm = min(tm, _MAX_ROW_TILE)
    tm = min(tm, _round_up(rows_per_split, 8))   # never bigger than the data
    return max(8, tm)


def _ijepa_partial_kernel(p_ref, t_ref, out_ref):
    """Grid = (split, row_tile).  out_ref is a resident (8, 128) per-split block
    whose every element holds that split's running sum of cosine similarities.

    p_ref, t_ref : (TM, C) tiles of predicted / target features (native dtype)
    out_ref      : (8, 128) f32 per-split partial-sum block
    """
    i = pl.program_id(1)

    @pl.when(i == 0)
    def _():
        out_ref[...] = jnp.zeros_like(out_ref)

    p = p_ref[...].astype(jnp.float32)
    t = t_ref[...].astype(jnp.float32)

    dots = jnp.sum(p * t, axis=-1, keepdims=True)   # (TM, 1)
    p_sq = jnp.sum(p * p, axis=-1, keepdims=True)
    t_sq = jnp.sum(t * t, axis=-1, keepdims=True)

    # 1 / max(||x||, eps) == rsqrt(max(||x||^2, eps^2));  runs on the EUP.
    inv_p = lax.rsqrt(jnp.maximum(p_sq, jnp.float32(_EPS_SQ)))
    inv_t = lax.rsqrt(jnp.maximum(t_sq, jnp.float32(_EPS_SQ)))
    sims = dots * inv_p * inv_t                      # zero-padded rows -> exactly 0

    # Broadcast the tile's scalar sum over the whole (8,128) block (one vreg).
    out_ref[...] += jnp.sum(sims)


def ijepa_loss(predicted_features, target_features):
    """Pallas implementation of IJEPALoss.forward.

    predicted_features, target_features: (B, N, C) arrays (any float dtype).
    Returns a scalar f32 loss.
    """
    assert predicted_features.shape == target_features.shape
    B, N, C = predicted_features.shape
    rows = B * N

    # Keep native dtype on the HBM->VMEM path (no wrapper up-cast).
    p2 = predicted_features.reshape(rows, C)
    t2 = target_features.reshape(rows, C)
    itemsize = max(jnp.dtype(p2.dtype).itemsize, jnp.dtype(t2.dtype).itemsize)

    splits = _NUM_ROW_SPLITS
    rows_per_split_target = -(-rows // splits)
    tm = _pick_row_tile(rows_per_split_target, C, itemsize)
    rows_per_split = _round_up(rows_per_split_target, tm)
    steps_per_split = rows_per_split // tm
    rows_padded = splits * rows_per_split

    if rows_padded != rows:
        pad = rows_padded - rows
        # Zero rows contribute exactly 0 to the similarity sum.
        p2 = jnp.pad(p2, ((0, pad), (0, 0)))
        t2 = jnp.pad(t2, ((0, pad), (0, 0)))

    def in_map(s, i):
        return (s * steps_per_split + i, 0)

    # NOTE: for production C that is a multiple of 128 (768/1024/1536) the
    # (tm, C) blocks are fully lane-dense; the C=32 demo wastes lanes but is
    # still correct (block last dim equals the full array dim).
    partials = pl.pallas_call(
        _ijepa_partial_kernel,
        out_shape=jax.ShapeDtypeStruct((8 * splits, 128), jnp.float32),
        grid_spec=pltpu.PrefetchScalarGridSpec(
            num_scalar_prefetch=0,
            grid=(splits, steps_per_split),
            in_specs=[
                pl.BlockSpec((tm, C), in_map),
                pl.BlockSpec((tm, C), in_map),
            ],
            # One resident (8,128) accumulator block per split; reduction axis last.
            out_specs=pl.BlockSpec((8, 128), lambda s, i: (s, 0)),
        ),
        compiler_params=pltpu.CompilerParams(
            dimension_semantics=("parallel", "arbitrary"),
        ),
    )(p2, t2)

    # Each split's block is a constant = its partial sum; pick one element per split.
    total = jnp.sum(partials[::8, 0])
    # Finish -mean() with the TRUE row count (padding contributed 0).
    return -(total / jnp.float32(rows))


def _reference_loss(p, t):
    """Pure-JAX reference mirroring the PyTorch module."""
    pf = p.astype(jnp.float32)
    tf = t.astype(jnp.float32)
    pn = pf / jnp.maximum(jnp.linalg.norm(pf, axis=-1, keepdims=True), _EPS)
    tn = tf / jnp.maximum(jnp.linalg.norm(tf, axis=-1, keepdims=True), _EPS)
    sim = jnp.einsum("bnc,bnc->bn", pn, tn)
    return -jnp.mean(sim)


if __name__ == "__main__":
    key = jax.random.PRNGKey(0)
    k1, k2 = jax.random.split(key)

    # Small f32 case (matches the module's bnc layout).
    B, N, C = 2, 8, 32
    pred = jax.random.normal(k1, (B, N, C), dtype=jnp.float32)
    targ = jax.random.normal(k2, (B, N, C), dtype=jnp.float32)
    loss = jax.block_until_ready(ijepa_loss(pred, targ))
    ref = jax.block_until_ready(_reference_loss(pred, targ))
    assert jnp.allclose(loss, ref, atol=1e-5, rtol=1e-5), (loss, ref)

    # Non-divisible row count + bf16 inputs: exercises padding and the
    # native-dtype (no wrapper up-cast) path.
    B2, N2, C2 = 3, 5, 32
    pred2 = jax.random.normal(k1, (B2, N2, C2), dtype=jnp.bfloat16)
    targ2 = jax.random.normal(k2, (B2, N2, C2), dtype=jnp.bfloat16)
    loss2 = jax.block_until_ready(ijepa_loss(pred2, targ2))
    ref2 = jax.block_until_ready(_reference_loss(pred2, targ2))
    assert jnp.allclose(loss2, ref2, atol=1e-4, rtol=1e-4), (loss2, ref2)

    print("KERNEL_OK")
</pallas_src>

<mosaic_0001>
module attributes {stable_mosaic.version = 11 : i64} {
  func.func @_ijepa_partial_kernel(%arg0: i32, %arg1: i32, %arg2: memref<8x32xf32, #tpu.memory_space<vmem>>, %arg3: memref<8x32xf32, #tpu.memory_space<vmem>>, %arg4: memref<8x128xf32, #tpu.memory_space<vmem>>) attributes {dimension_semantics = [#tpu.dimension_semantics<parallel>, #tpu.dimension_semantics<arbitrary>], iteration_bounds = array<i64: 2, 1>, scalar_prefetch = 0 : i64, scratch_operands = 0 : i64, tpu.core_type = #tpu.core_type<tc>, window_params = [{transform_indices = @transform_0, window_bounds = array<i64: 8, 32>}, {transform_indices = @transform_1, window_bounds = array<i64: 8, 32>}, {transform_indices = @transform_2, window_bounds = array<i64: 8, 128>}]} {
    %c0_i32 = arith.constant 0 : i32
    %0 = arith.cmpi eq, %arg1, %c0_i32 : i32
    %1 = arith.extui %0 : i1 to i32
    %c0_i32_0 = arith.constant 0 : i32
    %2 = arith.cmpi ne, %1, %c0_i32_0 : i32
    scf.if %2 {
      %cst_13 = arith.constant 0.000000e+00 : f32
      %30 = vector.broadcast %cst_13 : f32 to vector<8x128xf32>
      %c0_14 = arith.constant 0 : index
      %c0_15 = arith.constant 0 : index
      %31 = vector.load %arg4[%c0_14, %c0_15] : memref<8x128xf32, #tpu.memory_space<vmem>>, vector<8x128xf32>
      tpu.vector_store %arg4[%c0_14, %c0_15], %30 {strides = array<i32>} : memref<8x128xf32, #tpu.memory_space<vmem>>, vector<8x128xf32>,
    } else {
    }
    %c0 = arith.constant 0 : index
    %c0_1 = arith.constant 0 : index
    %3 = vector.load %arg2[%c0, %c0_1] : memref<8x32xf32, #tpu.memory_space<vmem>>, vector<8x32xf32>
    %c0_2 = arith.constant 0 : index
    %c0_3 = arith.constant 0 : index
    %4 = vector.load %arg3[%c0_2, %c0_3] : memref<8x32xf32, #tpu.memory_space<vmem>>, vector<8x32xf32>
    %5 = arith.mulf %3, %4 : vector<8x32xf32>
    %cst = arith.constant dense<0.000000e+00> : vector<8xf32>
    %6 = vector.multi_reduction <add>, %5, %cst [1] : vector<8x32xf32> to vector<8xf32>
    %7 = vector.shape_cast %6 : vector<8xf32> to vector<8x1xf32>
    %8 = arith.mulf %3, %3 : vector<8x32xf32>
    %cst_4 = arith.constant dense<0.000000e+00> : vector<8xf32>
    %9 = vector.multi_reduction <add>, %8, %cst_4 [1] : vector<8x32xf32> to vector<8xf32>
    %10 = vector.shape_cast %9 : vector<8xf32> to vector<8x1xf32>
    %11 = arith.mulf %4, %4 : vector<8x32xf32>
    %cst_5 = arith.constant dense<0.000000e+00> : vector<8xf32>
    %12 = vector.multi_reduction <add>, %11, %cst_5 [1] : vector<8x32xf32> to vector<8xf32>
    %13 = vector.shape_cast %12 : vector<8xf32> to vector<8x1xf32>
    %cst_6 = arith.constant 1.000000e-24 : f32
    %14 = vector.broadcast %cst_6 : f32 to vector<8x1xf32>
    %15 = arith.maximumf %10, %14 : vector<8x1xf32>
    %16 = math.rsqrt %15 : vector<8x1xf32>
    %cst_7 = arith.constant 1.000000e-24 : f32
    %17 = vector.broadcast %cst_7 : f32 to vector<8x1xf32>
    %18 = arith.maximumf %13, %17 : vector<8x1xf32>
    %19 = math.rsqrt %18 : vector<8x1xf32>
    %20 = arith.mulf %7, %16 : vector<8x1xf32>
    %21 = arith.mulf %20, %19 : vector<8x1xf32>
    %c0_8 = arith.constant 0 : index
    %c0_9 = arith.constant 0 : index
    %22 = vector.load %arg4[%c0_8, %c0_9] : memref<8x128xf32, #tpu.memory_space<vmem>>, vector<8x128xf32>
    %23 = vector.shape_cast %21 : vector<8x1xf32> to vector<1x8x1xf32>
    %cst_10 = arith.constant dense<0.000000e+00> : vector<1xf32>
    %24 = vector.multi_reduction <add>, %23, %cst_10 [1, 2] : vector<1x8x1xf32> to vector<1xf32>
    %25 = vector.shape_cast %24 : vector<1xf32> to vector<1x1x1xf32>
    %26 = vector.extract %25[0, 0, 0] : f32 from vector<1x1x1xf32>
    %27 = vector.broadcast %26 : f32 to vector<8x128xf32>
    %28 = arith.addf %22, %27 : vector<8x128xf32>
    %c0_11 = arith.constant 0 : index
    %c0_12 = arith.constant 0 : index
    %29 = vector.load %arg4[%c0_11, %c0_12] : memref<8x128xf32, #tpu.memory_space<vmem>>, vector<8x128xf32>
    tpu.vector_store %arg4[%c0_11, %c0_12], %28 {strides = array<i32>} : memref<8x128xf32, #tpu.memory_space<vmem>>, vector<8x128xf32>,
    return
  }
  func.func @transform_0(%arg0: i32, %arg1: i32) -> (i32, i32) {
    %c1_i32 = arith.constant 1 : i32
    %0 = arith.muli %arg0, %c1_i32 : i32
    %1 = arith.addi %0, %arg1 : i32
    %c0_i32 = arith.constant 0 : i32
    %c0_i32_0 = arith.constant 0 : i32
    return %1, %c0_i32 : i32, i32
  }
  func.func @transform_1(%arg0: i32, %arg1: i32) -> (i32, i32) {
    %c1_i32 = arith.constant 1 : i32
    %0 = arith.muli %arg0, %c1_i32 : i32
    %1 = arith.addi %0, %arg1 : i32
    %c0_i32 = arith.constant 0 : i32
    %c0_i32_0 = arith.constant 0 : i32
    return %1, %c0_i32 : i32, i32
  }
  func.func @transform_2(%arg0: i32, %arg1: i32) -> (i32, i32) {
    %c0_i32 = arith.constant 0 : i32
    %c0_i32_0 = arith.constant 0 : i32
    return %arg0, %c0_i32 : i32, i32
  }
}

</mosaic_0001>

<bundles_post_ra>
// kernel: tpu_custom_call.1
= control target key start
LH: loop header
LB: loop body
LE: loop exit
PB: predicated region body
PF: predicated region fallthrough
CT: control target
= control target key end

     0   :  { %7 = vsyncpa [#allocation3], 0  ;;  %s790_s0 = inlined_call_operand.hbm [shape: f32[16,32], index: 0, kind: input, shape index: {}]   ;;  %s791_s1 = inlined_call_operand.hbm [shape: f32[16,32], index: 1, kind: input, shape index: {}]   ;;  %s792_s2 = inlined_call_operand.hbm [shape: f32[16,128], index: 2, kind: output, shape index: {}]  }
   0x1   :  { %9 = vsyncpa [#allocation3 + $0x1], 0 }
   0x2   :  { %10 = vsyncpa [#allocation6], 0 }
   0x3   :  { %12 = vsyncpa [#allocation6 + $0x1], 0 }
   0x4   :  { %13 = vsyncpa [#allocation4], 0 }
   0x5   :  { %15 = vsyncpa [#allocation4 + $0x1], 0  ;;  %s624_s9 = smov 0   ;;  %s626_s10 = smov 0  }
   0x6   :  { %s628_s11 = smov 0   ;;  %s630_s12 = smov 0  }
   0x7   :  { %s632_s13 = smov 0   ;;  %s634_s14 = smov 0  }
   0x8 LB: > { %s374_s15 = sadd.s32 4294967295, %s604_s14   ;;  %s375_s16 = sadd.s32 4294967294, %s604_s14   ;;  %s604_s14 = sphi %s634_s14, %s21_s14   ;;  %s600_s13 = sphi %s632_s13, %s804_s13   ;;  %s596_s12 = sphi %s630_s12, %s803_s12   ;;  %s592_s11 = sphi %s628_s11, %s802_s11   ;;  %s588_s10 = sphi %s626_s10, %s801_s10   ;;  %s584_s9 = sphi %s624_s9, %s800_s9  }
   0x9   : > { %s33_s17 = sadd.s32 1, %s600_s13  ;;  %s42_s18 = sadd.s32 1, %s592_s11 }
   0xa   : > { %p35_p0 = scmp.ge.s32.totalorder %s33_s17, 2  ;;  %p49_p1 = scmp.ne.s32.totalorder %s592_s11, %s588_s10 }
   0xb   : > { %p50_p2 = scmp.eq.s32.totalorder %s604_s14, 0  ;;  %p55_p3 = scmp.ne.s32.totalorder %s588_s10, %s584_s9 }
   0xc   : > { %s806_s17 = smov (%p35_p0, %s33_s17), 0  ;;  %p56_p5 = scmp.eq.s32.totalorder %s374_s15, 0 }
   0xd   : > { %p665_p4 = por %p50_p2, %p49_p1  ;;  %s39_s20 = ssub.s32 %s600_s13, %s806_s17 }
   0xe   : > { %p107_p6 = scmp.eq.s32.totalorder %s374_s15, 1  ;;  %p40_p7 = scmp.eq.s32.totalorder %s39_s20, 0 }
   0xf   : > { %p671_p8 = por %p56_p5, %p55_p3  ;;  %p113_p10 = scmp.eq.s32.totalorder %s375_s16, 1 }
  0x10   : > { %p675_p9 = por %p107_p6, %p49_p1  ;;  %p409_p13 = scmp.lt.s32.totalorder %s604_s14, 2 }
  0x11   : > { %s680_s23 = scalar_select %p40_p7, %s592_s11, %s42_s18  }
  0x12   : > { %p682_p11 = por %p113_p10, %p55_p3  ;;  %s689_s25 = sand.u32 1, %s592_s11  }
  0x13   : > { %s378_s26 = sshll.u32 %s689_s25, 3  ;;  %s379_s27 = sshll.u32 %s600_s13, 7 }
  0x14   : > { %s143_s30 = scalar_lea.hbm %s790_s0, %s379_s27  ;;  %s137_s3 = scalar_lea.vmem [#allocation2], %s378_s26 }
  0x15   : > { %s145_s4 = sshll.u32 %s137_s3, 4  ;;  %p698_p0 = pnand %p409_p13, %p665_p4  ;;  %s146_s4 = int_to_ptr.vmem [resolvable:$true] %s145_s4 }
  0x16   : > { %p382_p1 = scmp.ge.s32.totalorder %s604_s14, 1  ;;  %p169_p2 = scmp.lt.s32.totalorder %s604_s14, 3 }
  0x17   : > { %s134_s6 = scalar_lea.sflag [#allocation3], %s689_s25  ;;  %p466_p3 = pneg %p698_p0 }
  0x18   : > { %s477_s7 = scalar_lea.vmem %s146_s4, 128  ;;  %s606_s8 = smov [#allocation2]  }
  0x19   : > { %p478_p5 = scmp.ne.s32.totalorder %s146_s4, %s477_s7  ;;  %s482_s15 = sshll.u32 %s606_s8, 4  ;;  %s483_s15 = int_to_ptr.vmem [resolvable:$false] %s482_s15 }
  0x1a   : > { %s484_s16 = scalar_lea.vmem %s483_s15, 256  ;;  %p485_p4 = scmp.lt.s32.totalorder %s146_s4, %s483_s15 }
  0x1b   : > { %p480_p6 = pnand %p478_p5, %p466_p3  ;;  %p486_p10 = scmp.lt.s32.totalorder %s484_s16, %s477_s7 }
  0x1d   : > { %p481_p7 = pneg %p480_p6  ;;  %p487_p13 = por %p486_p10, %p485_p4 }
  0x1f   : > { %p488_p12 = pnand %p487_p13, %p481_p7 }
  0x21   : > { %491 = shalt.err (!%p488_p12)
}
  0x22   : > { %401 = dma.hbm_to_vmem [thread:$0]  (!%p698_p0), %s143_s30, 128, %s146_s4, %s134_s6  }
  0x23   : > { %p716_p5 = pnand %p382_p1, %p169_p2  ;;  %s162_s28 = scalar_lea.hbm %s791_s1, %s379_s27 }
  0x24   : > { %s156_s29 = scalar_lea.vmem [#allocation5], %s378_s26  ;;  %s153_s7 = scalar_lea.sflag [#allocation6], %s689_s25 }
  0x25   : > { %s164_s3 = sshll.u32 %s156_s29, 4  ;;  %s607_s30 = smov [#allocation5]   ;;  %s165_s3 = int_to_ptr.vmem [resolvable:$true] %s164_s3 }
  0x26   : > { %s505_s8 = scalar_lea.vmem %s165_s3, 128  ;;  %s510_s4 = sshll.u32 %s607_s30, 4  ;;  %s511_s4 = int_to_ptr.vmem [resolvable:$false] %s510_s4 }
  0x27   : > { %p506_p12 = scmp.ne.s32.totalorder %s165_s3, %s505_s8  ;;  %s512_s6 = scalar_lea.vmem %s511_s4, 256 }
  0x28   : > { %p513_p1 = scmp.lt.s32.totalorder %s165_s3, %s511_s4  ;;  %p514_p2 = scmp.lt.s32.totalorder %s512_s6, %s505_s8 }
  0x29   : > { %p508_p6 = pnand %p506_p12, %p466_p3 }
  0x2a   : > { %p515_p4 = por %p514_p2, %p513_p1 }
  0x2b   : > { %p509_p7 = pneg %p508_p6 }
  0x2d   : > { %p516_p10 = pnand %p515_p4, %p509_p7 }
  0x2f   : > { %519 = shalt.err (!%p516_p10)
}
  0x30   : > { %404 = dma.hbm_to_vmem [thread:$0]  (!%p698_p0), %s162_s28, 128, %s165_s3, %s153_s7  }
  0x31   : > { %173 = sbr.rel (%p716_p5) target bundleno = 436 (0x1b4), region = 28  ;;  %s732_s25 = sand.u32 (!%p716_p5), 1, %s588_s10  }
  0x32   : > { %s735_s26 = sshll.u32 (!%p716_p5), %s732_s25, 3  ;;  %s176_s27 = scalar_lea.sflag (!%p716_p5), [#allocation3], %s732_s25 }
  0x33   : > { %s179_s15 = scalar_lea.vmem (!%p716_p5), [#allocation2], %s735_s26 }
  0x36   : > { %571 = dma.done.wait (%p671_p8), %s176_s27, 128  }
  0x37   : > { %573 = vsyncadd (%p671_p8), %s176_s27, 4294967168  ;;  %s185_s5 = scalar_lea.sflag [#allocation6], %s732_s25  ;;  %s188_s16 = scalar_lea.vmem [#allocation5], %s735_s26 }
  0x38   : > { %575 = dma.done.wait (%p671_p8), %s185_s5, 128  }
  0x39   : > { %577 = vsyncadd (%p671_p8), %s185_s5, 4294967168  ;;  %v221_v0 = vld [vmem:[%s179_s15] sm:$0xff]  ;;  %vm224_vm0 = vcmask 261120   ;;  %v222_v1 = vld [vmem:[%s188_s16] sm:$0xff]  ;;  %vm243_vm1 = vcmask 7168   ;;  %s387_s21 = sshll.u32 %s596_s12, 7 }
  0x3a   : > { %v228_v2 = vmul.f32 %v221_v0, %v221_v0  ;;  %v232_v3 = vmul.f32 %v222_v1, %v222_v1  ;;  %v223_v4 = vmul.f32 %v222_v1, %v221_v0  ;;  %s213_s18 = scalar_lea.vmem [#allocation7], %s735_s26  ;;  %s269_s3 = scalar_lea.hbm %s792_s2, %s387_s21 }
  0x3b   : > { %s271_s19 = sshll.u32 %s213_s18, 4  ;;  %s258_s7 = scalar_lea.sflag [#allocation4], %s732_s25  ;;  %s272_s19 = int_to_ptr.vmem [resolvable:$true] %s271_s19 }
  0x3c   : > { %v229_v5 = vsel %vm224_vm0, %v228_v2, 0.0  ;;  %v225_v6 = vsel %vm224_vm0, %v223_v4, 0.0  ;;  %v233_v7 = vsel %vm224_vm0, %v232_v3, 0.0  ;;  %s520_s8 = scalar_lea.vmem %s272_s19, 128  ;;  %s608_s30 = smov [#allocation7]  }
  0x3d   : > { %230 = vadd.xlane.f32.xlu0 %v229_v5  ;;  %226 = vadd.xlane.f32.xlu1 %v225_v6  ;;  %p521_p8 = scmp.ne.s32.totalorder %s272_s19, %s520_s8  ;;  %s524_s4 = sshll.u32 %s608_s30, 4  ;;  %s525_s4 = int_to_ptr.vmem [resolvable:$false] %s524_s4 }
  0x3e   : > { %s526_s12 = scalar_lea.vmem %s525_s4, 256  ;;  %p527_p13 = scmp.lt.s32.totalorder %s272_s19, %s525_s4 }
  0x3f   : > { %p522_p0 = pnand %p521_p8, %p675_p9  ;;  %p528_p5 = scmp.lt.s32.totalorder %s526_s12, %s520_s8 }
  0x41   : > { %234 = vadd.xlane.f32.xlu0 %v233_v7  ;;  %p523_p3 = pneg %p522_p0  ;;  %p529_p12 = por %p528_p5, %p527_p13 }
  0x43   : > { %p530_p6 = pnand %p529_p12, %p523_p3 }
  0xc6   : > { %v231_v8 = vpop.xlane.xlu0 %230  ;;  %v227_v13 = vpop.xlane.xlu1 %226 }
  0xc7   : > { %v236_v9 = vmax.f32 %v231_v8, 1e-24 }
  0xc9   : > { %460 = vrsqrt.f32 %v236_v9 }
  0xca   : > { %v235_v10 = vpop.xlane.xlu0 %234 }
  0xcb   : > { %v238_v11 = vmax.f32 %v235_v10, 1e-24 }
  0xcd   : > { %462 = vrsqrt.f32 %v238_v11 }
  0xd6   : > { %v461_v12 = vpop.eup %460 }
  0xd7   : > { %v240_v14 = vmul.f32 %v461_v12, %v227_v13 }
  0xda   : > { %v463_v15 = vpop.eup %462 }
  0xdb   : > { %v241_v16 = vmul.f32 %v463_v15, %v240_v14 }
  0xdd   : > { %v244_v17 = vsel %vm243_vm1, %v241_v16, 0.0 }
  0xde   : > { %245 = vadd.xlane.f32.xlu1 %v244_v17 }
 0x167   : > { %v246_v18 = vpop.xlane.xlu1 %245 }
 0x168   : > { %v247_v19 = vrot.slane %v246_v18, 4 }
 0x16a   : > { %v248_v20 = vadd.f32 %v247_v19, %v246_v18 }
 0x16c   : > { %v249_v21 = vrot.slane %v248_v20, 2 }
 0x16e   : > { %v250_v22 = vadd.f32 %v249_v21, %v248_v20 }
 0x170   : > { %v251_v23 = vrot.slane %v250_v22, 1 }
 0x172   : > { %v252_v24 = vadd.f32 %v251_v23, %v250_v22 }
 0x174   : > { %390 = vpush %v252_v24 }
 0x1a5   : > { %s391_s20 = spop %390 }
 0x1a6   : > { %v254_v25 = vstv %s391_s20 }
 0x1a7   : > { %256 = vst [vmem:[%s213_s18] sm:$0xff] %v254_v25 }
 0x1a8   : > { %533 = shalt.err (!%p530_p6)
}
 0x1a9   : > { %s534_s6 = scalar_lea.hbm %s269_s3, 128  ;;  %s538_s27 = scalar_lea.hbm %s792_s2, 256 }
 0x1aa   : > { %p535_p7 = scmp.ne.s32.totalorder %s269_s3, %s534_s6  ;;  %p539_p4 = scmp.lt.s32.totalorder %s269_s3, %s792_s2 }
 0x1ab   : > { %p540_p10 = scmp.lt.s32.totalorder %s538_s27, %s534_s6 }
 0x1ac   : > { %p536_p1 = pnand %p535_p7, %p675_p9 }
 0x1ad   : > { %p541_p8 = por %p540_p10, %p539_p4 }
 0x1ae   : > { %p537_p2 = pneg %p536_p1 }
 0x1b0   : > { %p542_p0 = pnand %p541_p8, %p537_p2 }
 0x1b2   : > { %545 = shalt.err (!%p542_p0)
}
 0x1b3   : > { %396 = dma.vmem_to_hbm [thread:$0]  (%p675_p9), %s272_s19, 128, %s269_s3, %s258_s7  }
 0x1b4 PF: > { %s283_s16 = sand.u32 1, %s584_s9   ;;  %p799_p3 = scmp.ge.s32.totalorder %s604_s14, 2 }
 0x1b5   : > { %s284_s21 = scalar_lea.sflag [#allocation4], %s283_s16 }
 0x1b6   : > { %p406_p13 = pnand %p799_p3, %p682_p11 }
 0x1b8   : > { %p407_p5 = pneg %p406_p13 }
 0x1ba   : > { %579 = dma.done.wait (%p407_p5), %s284_s21, 128  }
 0x1bb   : > { %581 = vsyncadd (%p407_p5), %s284_s21, 4294967168  ;;  %s21_s14 = sadd.s32 1, %s604_s14   ;;  %s800_s9 = smov %s588_s10 }
 0x1bc   : > { %p18_p12 = scmp.ge.s32.totalorder %s21_s14, 4   ;;  %s801_s10 = smov %s592_s11 }
 0x1bd   : > { %s802_s11 = smov %s680_s23  ;;  %s803_s12 = smov %s600_s13 }
 0x1be   : > { %s804_s13 = smov %s806_s17  ;;  %20 = sbr.rel (!%p18_p12) target bundleno = 8 (0x8), region = 90 }
 0x1c3   :  { %289 = vsyncpa [#allocation3], 1 }
 0x1c4   :  { %291 = vsyncpa [#allocation3 + $0x1], 1 }
 0x1c5   :  { %292 = vsyncpa [#allocation6], 1 }
 0x1c6   :  { %294 = vsyncpa [#allocation6 + $0x1], 1 }
 0x1c7   :  { %295 = vsyncpa [#allocation4], 1 }
 0x1c8   :  { %297 = vsyncpa [#allocation4 + $0x1], 1 }

</bundles_post_ra>
